<compile_context>
chip_gen: v6e
topology: v6e:2x2x1
jax: 0.10.0
libtpu: 0.0.40
codegen_flags: <defaults>
</compile_context>

<pallas_src>
import functools

import jax
import jax.numpy as jnp
from jax.experimental import pallas as pl
from jax.experimental.pallas import tpu as pltpu


def _make_conv_kernel(k, wp, th):
    """Kernel for one (batch, H-tile) grid step.

    x_ref : (1, 1, C, (TH + 2p + 1) * Wp)  padded, flattened halo'd row tile
    w_ref : (k*k, Cout, C)                 per-tap weight matrices
    b_ref : (Cout, 1)                      bias column
    o_ref : (1, Cout, TH * Wp)             "wide" rows (pad columns dropped in wrapper)
    """
    l_out = th * wp

    def kernel(x_ref, w_ref, b_ref, o_ref):
        acc = None
        for dh in range(k):
            for dw in range(k):
                start = dh * wp + dw
                xs = x_ref[0, 0, :, pl.ds(start, l_out)]              # (C, TH*Wp)
                part = jnp.dot(w_ref[dh * k + dw], xs,                # (Cout, TH*Wp)
                               preferred_element_type=jnp.float32)
                acc = part if acc is None else acc + part
        acc = acc + b_ref[...]                                        # lane-broadcast bias
        o_ref[0] = jnp.maximum(acc, 0.2 * acc).astype(o_ref.dtype)    # LeakyReLU(0.2)

    return kernel


def _pick_tile_h(h, wp, c, bytes_per_elem=4, target_tile_bytes=2 * 1024 * 1024):
    """Largest TH that divides H, keeps the input tile ~<=2 MiB (so double-buffering
    fits comfortably in scoped VMEM on v5e/v6e/v7x), and keeps the output block's lane
    width (TH*Wp) a multiple of 128 whenever the image is split into >1 tile."""
    row_bytes = max(1, c * wp * bytes_per_elem)
    max_rows = max(8, target_tile_bytes // row_bytes)
    if h <= max_rows:
        return h
    for th in range(min(h, max_rows), 0, -1):
        if h % th == 0 and (th * wp) % 128 == 0:
            return th
    return h  # fallback: single tile (correct, just larger VMEM footprint)


@functools.partial(jax.jit, static_argnames=("kernel_size",))
def conv_layer_forward(x, weight, bias, kernel_size):
    """x: (N, C, H, W) f32; weight: (Cout, C, k, k); bias: (Cout,). Returns NCHW."""
    n, c, h, w = x.shape
    cout = weight.shape[0]
    k = kernel_size
    assert k % 2 == 1, "ConvLayer uses 'same' padding; odd kernel_size expected"
    p = k // 2
    wp = w + 2 * p

    th = _pick_tile_h(h, wp, c)
    n_th = h // th
    thp1 = th + 2 * p + 1          # halo rows + 1 guard row (feeds only discarded cols)
    tfl = thp1 * wp                # flattened tile length
    l_out = th * wp                # flattened (wide) output rows per tile

    # Zero-pad H by (p, p+1) and W by (p, p); the extra bottom row is a guard so the
    # last tap's flat slice never reads out of bounds (it only lands in pad columns).
    xp = jnp.pad(x, ((0, 0), (0, 0), (p, p + 1), (p, p)))         # (N, C, H+2p+1, Wp)

    if n_th == 1:
        xt = xp.reshape(n, 1, c, tfl)                             # free reshape
    else:
        # Overlapping halo'd row tiles (~(2p+1)/TH duplication, a few %).
        # TODO(synk): for extremely wide rows also tile W (needs in-kernel column masks).
        xt = jnp.stack(
            [xp[:, :, t * th:t * th + thp1, :] for t in range(n_th)], axis=1)
        xt = xt.reshape(n, n_th, c, tfl)

    # Per-tap (Cout, C) weight matrices; bias as a column for lane broadcast.
    w_taps = weight.transpose(2, 3, 0, 1).reshape(k * k, cout, c)
    b_col = bias.reshape(cout, 1)

    kernel = _make_conv_kernel(k, wp, th)

    out_wide = pl.pallas_call(
        kernel,
        out_shape=jax.ShapeDtypeStruct((n, cout, h * wp), x.dtype),
        grid=(n, n_th),
        in_specs=[
            pl.BlockSpec((1, 1, c, tfl), lambda i, t: (i, t, 0, 0)),
            pl.BlockSpec((k * k, cout, c), lambda i, t: (0, 0, 0)),
            pl.BlockSpec((cout, 1), lambda i, t: (0, 0)),
        ],
        out_specs=pl.BlockSpec((1, cout, l_out), lambda i, t: (i, 0, t)),
        compiler_params=pltpu.CompilerParams(
            dimension_semantics=("parallel", "parallel")),
    )(xt, w_taps, b_col)

    # (N, Cout, H*Wp) -> (N, Cout, H, Wp) is a free contiguous reshape (output is
    # already in NCHW order); then drop the 2*p pad columns per row.
    out = out_wide.reshape(n, cout, h, wp)[:, :, :, :w]
    return out


if __name__ == "__main__":
    # Module config: ConvLayer(in_channels=4, out_channels=8, kernel_size=3)
    in_channels, out_channels, kernel_size = 4, 8, 3
    N, H, W = 2, 16, 16

    key = jax.random.PRNGKey(0)
    kx, kw, kb = jax.random.split(key, 3)

    x = jax.random.normal(kx, (N, in_channels, H, W), dtype=jnp.float32)
    fan_in = in_channels * kernel_size * kernel_size
    weight = jax.random.normal(
        kw, (out_channels, in_channels, kernel_size, kernel_size),
        dtype=jnp.float32) * (1.0 / jnp.sqrt(fan_in))
    bias = jax.random.normal(kb, (out_channels,), dtype=jnp.float32) * 0.1

    out = conv_layer_forward(x, weight, bias, kernel_size)
    out = jax.block_until_ready(out)

    # Reference: XLA conv + bias + LeakyReLU(0.2).
    ref = jax.lax.conv_general_dilated(
        x, weight, window_strides=(1, 1),
        padding=[(kernel_size // 2, kernel_size // 2)] * 2,
        dimension_numbers=("NCHW", "OIHW", "NCHW"))
    ref = ref + bias.reshape(1, out_channels, 1, 1)
    ref = jnp.maximum(ref, 0.2 * ref)

    assert out.shape == (N, out_channels, H, W)
    assert jnp.allclose(out, ref, atol=1e-4, rtol=1e-4)

    print("KERNEL_OK")
</pallas_src>

<mosaic_0001>
module attributes {stable_mosaic.version = 11 : i64} {
  func.func @kernel(%arg0: i32, %arg1: i32, %arg2: memref<1x1x4x342xf32, #tpu.memory_space<vmem>>, %arg3: memref<9x8x4xf32, #tpu.memory_space<vmem>>, %arg4: memref<8x1xf32, #tpu.memory_space<vmem>>, %arg5: memref<1x8x288xf32, #tpu.memory_space<vmem>>) attributes {dimension_semantics = [#tpu.dimension_semantics<parallel>, #tpu.dimension_semantics<parallel>], iteration_bounds = array<i64: 2, 1>, scalar_prefetch = 0 : i64, scratch_operands = 0 : i64, tpu.core_type = #tpu.core_type<tc>, window_params = [{transform_indices = @transform_0, window_bounds = array<i64: 1, 1, 4, 342>}, {pipeline_mode = #tpu.pipeline_mode<synchronous>, transform_indices = @transform_1, window_bounds = array<i64: 9, 8, 4>}, {pipeline_mode = #tpu.pipeline_mode<synchronous>, transform_indices = @transform_2, window_bounds = array<i64: 8, 1>}, {transform_indices = @transform_3, window_bounds = array<i64: 1, 8, 288>}]} {
    %c0 = arith.constant 0 : index
    %c0_0 = arith.constant 0 : index
    %c0_1 = arith.constant 0 : index
    %c0_2 = arith.constant 0 : index
    %0 = vector.load %arg2[%c0, %c0_0, %c0_1, %c0_2] : memref<1x1x4x342xf32, #tpu.memory_space<vmem>>, vector<1x1x4x288xf32>
    %1 = vector.shape_cast %0 : vector<1x1x4x288xf32> to vector<4x288xf32>
    %c0_3 = arith.constant 0 : index
    %c0_4 = arith.constant 0 : index
    %c0_5 = arith.constant 0 : index
    %2 = vector.load %arg3[%c0_3, %c0_4, %c0_5] : memref<9x8x4xf32, #tpu.memory_space<vmem>>, vector<1x8x4xf32>
    %3 = vector.shape_cast %2 : vector<1x8x4xf32> to vector<8x4xf32>
    %cst = arith.constant dense<0.000000e+00> : vector<8x288xf32>
    %4 = tpu.matmul %3, %1, %cst {dimension_numbers = #tpu.dot_dimension_numbers<[1], [0], [0], [1], [0, 0, 1, 1], [], []>} : vector<8x4xf32>, vector<4x288xf32>, vector<8x288xf32> -> vector<8x288xf32>
    %c0_6 = arith.constant 0 : index
    %c0_7 = arith.constant 0 : index
    %c0_8 = arith.constant 0 : index
    %c1 = arith.constant 1 : index
    %5 = vector.load %arg2[%c0_6, %c0_7, %c0_8, %c1] : memref<1x1x4x342xf32, #tpu.memory_space<vmem>>, vector<1x1x4x288xf32>
    %6 = vector.shape_cast %5 : vector<1x1x4x288xf32> to vector<4x288xf32>
    %c1_9 = arith.constant 1 : index
    %c0_10 = arith.constant 0 : index
    %c0_11 = arith.constant 0 : index
    %7 = vector.load %arg3[%c1_9, %c0_10, %c0_11] : memref<9x8x4xf32, #tpu.memory_space<vmem>>, vector<1x8x4xf32>
    %8 = vector.shape_cast %7 : vector<1x8x4xf32> to vector<8x4xf32>
    %cst_12 = arith.constant dense<0.000000e+00> : vector<8x288xf32>
    %9 = tpu.matmul %8, %6, %cst_12 {dimension_numbers = #tpu.dot_dimension_numbers<[1], [0], [0], [1], [0, 0, 1, 1], [], []>} : vector<8x4xf32>, vector<4x288xf32>, vector<8x288xf32> -> vector<8x288xf32>
    %10 = arith.addf %4, %9 : vector<8x288xf32>
    %c0_13 = arith.constant 0 : index
    %c0_14 = arith.constant 0 : index
    %c0_15 = arith.constant 0 : index
    %c2 = arith.constant 2 : index
    %11 = vector.load %arg2[%c0_13, %c0_14, %c0_15, %c2] : memref<1x1x4x342xf32, #tpu.memory_space<vmem>>, vector<1x1x4x288xf32>
    %12 = vector.shape_cast %11 : vector<1x1x4x288xf32> to vector<4x288xf32>
    %c2_16 = arith.constant 2 : index
    %c0_17 = arith.constant 0 : index
    %c0_18 = arith.constant 0 : index
    %13 = vector.load %arg3[%c2_16, %c0_17, %c0_18] : memref<9x8x4xf32, #tpu.memory_space<vmem>>, vector<1x8x4xf32>
    %14 = vector.shape_cast %13 : vector<1x8x4xf32> to vector<8x4xf32>
    %cst_19 = arith.constant dense<0.000000e+00> : vector<8x288xf32>
    %15 = tpu.matmul %14, %12, %cst_19 {dimension_numbers = #tpu.dot_dimension_numbers<[1], [0], [0], [1], [0, 0, 1, 1], [], []>} : vector<8x4xf32>, vector<4x288xf32>, vector<8x288xf32> -> vector<8x288xf32>
    %16 = arith.addf %10, %15 : vector<8x288xf32>
    %c0_20 = arith.constant 0 : index
    %c0_21 = arith.constant 0 : index
    %c0_22 = arith.constant 0 : index
    %c18 = arith.constant 18 : index
    %17 = vector.load %arg2[%c0_20, %c0_21, %c0_22, %c18] : memref<1x1x4x342xf32, #tpu.memory_space<vmem>>, vector<1x1x4x288xf32>
    %18 = vector.shape_cast %17 : vector<1x1x4x288xf32> to vector<4x288xf32>
    %c3 = arith.constant 3 : index
    %c0_23 = arith.constant 0 : index
    %c0_24 = arith.constant 0 : index
    %19 = vector.load %arg3[%c3, %c0_23, %c0_24] : memref<9x8x4xf32, #tpu.memory_space<vmem>>, vector<1x8x4xf32>
    %20 = vector.shape_cast %19 : vector<1x8x4xf32> to vector<8x4xf32>
    %cst_25 = arith.constant dense<0.000000e+00> : vector<8x288xf32>
    %21 = tpu.matmul %20, %18, %cst_25 {dimension_numbers = #tpu.dot_dimension_numbers<[1], [0], [0], [1], [0, 0, 1, 1], [], []>} : vector<8x4xf32>, vector<4x288xf32>, vector<8x288xf32> -> vector<8x288xf32>
    %22 = arith.addf %16, %21 : vector<8x288xf32>
    %c0_26 = arith.constant 0 : index
    %c0_27 = arith.constant 0 : index
    %c0_28 = arith.constant 0 : index
    %c19 = arith.constant 19 : index
    %23 = vector.load %arg2[%c0_26, %c0_27, %c0_28, %c19] : memref<1x1x4x342xf32, #tpu.memory_space<vmem>>, vector<1x1x4x288xf32>
    %24 = vector.shape_cast %23 : vector<1x1x4x288xf32> to vector<4x288xf32>
    %c4 = arith.constant 4 : index
    %c0_29 = arith.constant 0 : index
    %c0_30 = arith.constant 0 : index
    %25 = vector.load %arg3[%c4, %c0_29, %c0_30] : memref<9x8x4xf32, #tpu.memory_space<vmem>>, vector<1x8x4xf32>
    %26 = vector.shape_cast %25 : vector<1x8x4xf32> to vector<8x4xf32>
    %cst_31 = arith.constant dense<0.000000e+00> : vector<8x288xf32>
    %27 = tpu.matmul %26, %24, %cst_31 {dimension_numbers = #tpu.dot_dimension_numbers<[1], [0], [0], [1], [0, 0, 1, 1], [], []>} : vector<8x4xf32>, vector<4x288xf32>, vector<8x288xf32> -> vector<8x288xf32>
    %28 = arith.addf %22, %27 : vector<8x288xf32>
    %c0_32 = arith.constant 0 : index
    %c0_33 = arith.constant 0 : index
    %c0_34 = arith.constant 0 : index
    %c20 = arith.constant 20 : index
    %29 = vector.load %arg2[%c0_32, %c0_33, %c0_34, %c20] : memref<1x1x4x342xf32, #tpu.memory_space<vmem>>, vector<1x1x4x288xf32>
    %30 = vector.shape_cast %29 : vector<1x1x4x288xf32> to vector<4x288xf32>
    %c5 = arith.constant 5 : index
    %c0_35 = arith.constant 0 : index
    %c0_36 = arith.constant 0 : index
    %31 = vector.load %arg3[%c5, %c0_35, %c0_36] : memref<9x8x4xf32, #tpu.memory_space<vmem>>, vector<1x8x4xf32>
    %32 = vector.shape_cast %31 : vector<1x8x4xf32> to vector<8x4xf32>
    %cst_37 = arith.constant dense<0.000000e+00> : vector<8x288xf32>
    %33 = tpu.matmul %32, %30, %cst_37 {dimension_numbers = #tpu.dot_dimension_numbers<[1], [0], [0], [1], [0, 0, 1, 1], [], []>} : vector<8x4xf32>, vector<4x288xf32>, vector<8x288xf32> -> vector<8x288xf32>
    %34 = arith.addf %28, %33 : vector<8x288xf32>
    %c0_38 = arith.constant 0 : index
    %c0_39 = arith.constant 0 : index
    %c0_40 = arith.constant 0 : index
    %c36 = arith.constant 36 : index
    %35 = vector.load %arg2[%c0_38, %c0_39, %c0_40, %c36] : memref<1x1x4x342xf32, #tpu.memory_space<vmem>>, vector<1x1x4x288xf32>
    %36 = vector.shape_cast %35 : vector<1x1x4x288xf32> to vector<4x288xf32>
    %c6 = arith.constant 6 : index
    %c0_41 = arith.constant 0 : index
    %c0_42 = arith.constant 0 : index
    %37 = vector.load %arg3[%c6, %c0_41, %c0_42] : memref<9x8x4xf32, #tpu.memory_space<vmem>>, vector<1x8x4xf32>
    %38 = vector.shape_cast %37 : vector<1x8x4xf32> to vector<8x4xf32>
    %cst_43 = arith.constant dense<0.000000e+00> : vector<8x288xf32>
    %39 = tpu.matmul %38, %36, %cst_43 {dimension_numbers = #tpu.dot_dimension_numbers<[1], [0], [0], [1], [0, 0, 1, 1], [], []>} : vector<8x4xf32>, vector<4x288xf32>, vector<8x288xf32> -> vector<8x288xf32>
    %40 = arith.addf %34, %39 : vector<8x288xf32>
    %c0_44 = arith.constant 0 : index
    %c0_45 = arith.constant 0 : index
    %c0_46 = arith.constant 0 : index
    %c37 = arith.constant 37 : index
    %41 = vector.load %arg2[%c0_44, %c0_45, %c0_46, %c37] : memref<1x1x4x342xf32, #tpu.memory_space<vmem>>, vector<1x1x4x288xf32>
    %42 = vector.shape_cast %41 : vector<1x1x4x288xf32> to vector<4x288xf32>
    %c7 = arith.constant 7 : index
    %c0_47 = arith.constant 0 : index
    %c0_48 = arith.constant 0 : index
    %43 = vector.load %arg3[%c7, %c0_47, %c0_48] : memref<9x8x4xf32, #tpu.memory_space<vmem>>, vector<1x8x4xf32>
    %44 = vector.shape_cast %43 : vector<1x8x4xf32> to vector<8x4xf32>
    %cst_49 = arith.constant dense<0.000000e+00> : vector<8x288xf32>
    %45 = tpu.matmul %44, %42, %cst_49 {dimension_numbers = #tpu.dot_dimension_numbers<[1], [0], [0], [1], [0, 0, 1, 1], [], []>} : vector<8x4xf32>, vector<4x288xf32>, vector<8x288xf32> -> vector<8x288xf32>
    %46 = arith.addf %40, %45 : vector<8x288xf32>
    %c0_50 = arith.constant 0 : index
    %c0_51 = arith.constant 0 : index
    %c0_52 = arith.constant 0 : index
    %c38 = arith.constant 38 : index
    %47 = vector.load %arg2[%c0_50, %c0_51, %c0_52, %c38] : memref<1x1x4x342xf32, #tpu.memory_space<vmem>>, vector<1x1x4x288xf32>
    %48 = vector.shape_cast %47 : vector<1x1x4x288xf32> to vector<4x288xf32>
    %c8 = arith.constant 8 : index
    %c0_53 = arith.constant 0 : index
    %c0_54 = arith.constant 0 : index
    %49 = vector.load %arg3[%c8, %c0_53, %c0_54] : memref<9x8x4xf32, #tpu.memory_space<vmem>>, vector<1x8x4xf32>
    %50 = vector.shape_cast %49 : vector<1x8x4xf32> to vector<8x4xf32>
    %cst_55 = arith.constant dense<0.000000e+00> : vector<8x288xf32>
    %51 = tpu.matmul %50, %48, %cst_55 {dimension_numbers = #tpu.dot_dimension_numbers<[1], [0], [0], [1], [0, 0, 1, 1], [], []>} : vector<8x4xf32>, vector<4x288xf32>, vector<8x288xf32> -> vector<8x288xf32>
    %52 = arith.addf %46, %51 : vector<8x288xf32>
    %c0_56 = arith.constant 0 : index
    %c0_57 = arith.constant 0 : index
    %53 = vector.load %arg4[%c0_56, %c0_57] : memref<8x1xf32, #tpu.memory_space<vmem>>, vector<8x1xf32>
    %54 = vector.broadcast %53 : vector<8x1xf32> to vector<8x288xf32>
    %55 = arith.addf %52, %54 : vector<8x288xf32>
    %cst_58 = arith.constant 2.000000e-01 : f32
    %56 = vector.broadcast %cst_58 : f32 to vector<8x288xf32>
    %57 = arith.mulf %56, %55 : vector<8x288xf32>
    %58 = arith.maximumf %55, %57 : vector<8x288xf32>
    %c0_59 = arith.constant 0 : index
    %c0_60 = arith.constant 0 : index
    %c0_61 = arith.constant 0 : index
    %59 = vector.load %arg5[%c0_59, %c0_60, %c0_61] : memref<1x8x288xf32, #tpu.memory_space<vmem>>, vector<1x8x288xf32>
    %60 = vector.shape_cast %59 : vector<1x8x288xf32> to vector<8x288xf32>
    %61 = vector.shape_cast %58 : vector<8x288xf32> to vector<1x8x288xf32>
    tpu.vector_store %arg5[%c0_59, %c0_60, %c0_61], %61 {strides = array<i32>} : memref<1x8x288xf32, #tpu.memory_space<vmem>>, vector<1x8x288xf32>,
    return
  }
  func.func @transform_0(%arg0: i32, %arg1: i32) -> (i32, i32, i32, i32) {
    %c0_i32 = arith.constant 0 : i32
    %c0_i32_0 = arith.constant 0 : i32
    %c0_i32_1 = arith.constant 0 : i32
    return %arg0, %arg1, %c0_i32, %c0_i32_0 : i32, i32, i32, i32
  }
  func.func @transform_1(%arg0: i32, %arg1: i32) -> (i32, i32, i32) {
    %c0_i32 = arith.constant 0 : i32
    %c0_i32_0 = arith.constant 0 : i32
    %c0_i32_1 = arith.constant 0 : i32
    %c0_i32_2 = arith.constant 0 : i32
    return %c0_i32, %c0_i32_0, %c0_i32_1 : i32, i32, i32
  }
  func.func @transform_2(%arg0: i32, %arg1: i32) -> (i32, i32) {
    %c0_i32 = arith.constant 0 : i32
    %c0_i32_0 = arith.constant 0 : i32
    %c0_i32_1 = arith.constant 0 : i32
    return %c0_i32, %c0_i32_0 : i32, i32
  }
  func.func @transform_3(%arg0: i32, %arg1: i32) -> (i32, i32, i32) {
    %c0_i32 = arith.constant 0 : i32
    %c0_i32_0 = arith.constant 0 : i32
    return %arg0, %c0_i32, %arg1 : i32, i32, i32
  }
}

</mosaic_0001>

<bundles_post_ra>
// kernel: conv_layer_forward.1
= control target key start
LH: loop header
LB: loop body
LE: loop exit
PB: predicated region body
PF: predicated region fallthrough
CT: control target
= control target key end

     0   :  { %s2038_s12 = smov 0   ;;  %s2040_s13 = smov 0   ;;  %s2227_s0 = inlined_call_operand.vmem [shape: f32[2,1,4,342], index: 0, kind: input, shape index: {}]   ;;  %s2228_s1 = inlined_call_operand.vmem [shape: f32[9,8,4], index: 1, kind: input, shape index: {}]   ;;  %s2229_s2 = inlined_call_operand.vmem [shape: f32[8,1], index: 2, kind: input, shape index: {}]   ;;  %s2230_s3 = inlined_call_operand.vmem [shape: f32[2,8,288], index: 3, kind: output, shape index: {}]  }
   0x1   :  { %s2042_s14 = smov 0  }
   0x2 LB: > { %s25_s15 = sadd.s32 1, %s2001_s13  ;;  %p1823_p0 = scmp.ge.s32.totalorder %s2005_s14, 1  ;;  %s2005_s14 = sphi %s2042_s14, %s13_s14   ;;  %s2001_s13 = sphi %s2040_s13, %s2232_s13   ;;  %s1997_s12 = sphi %s2038_s12, %s2231_s12  }
   0x3   : > { %p27_p1 = scmp.ge.s32.totalorder %s25_s15, 2  ;;  %p157_p2 = scmp.lt.s32.totalorder %s2005_s14, 3 }
   0x5   : > { %s2234_s15 = smov (%p27_p1, %s25_s15), 0  ;;  %p158_p3 = pnand %p1823_p0, %p157_p2 }
   0x6   : > { %p189_p4 = scmp.lt.s32.totalorder (!%p158_p3), %s1997_s12, 1  ;;  %s2009_s20 = smov (!%p158_p3), 127  }
   0x7   : > { %161 = sbr.rel (%p158_p3) target bundleno = 383 (0x17f), region = 32  ;;  %s2010_s21 = smov (!%p158_p3), 126  }
   0x8   : > { %s2011_s22 = smov (!%p158_p3), 110   ;;  %s2012_s23 = smov (!%p158_p3), 109  }
   0x9   : > { %s2013_s24 = smov (!%p158_p3), 108   ;;  %s2014_s25 = smov (!%p158_p3), 92  }
   0xa   : > { %s2016_s26 = smov (!%p158_p3), 91   ;;  %s2017_s27 = smov (!%p158_p3), 90  }
   0xc   : > { %v2007_v0 = vmov 0.0   ;;  %vm2008_vm0 = vmmov 0   ;;  %s2236_s12 = smov (!%p189_p4, %s1997_s12), 1  ;;  %v2015_v10 = vmov 0   ;;  %v1710_v12 = vld [vmem:[%s2229_s2] sm:$0xff]  ;;  %vm229_vm1 = vcmask 1043456  }
   0xd   : > { %1899 = vmatprep.subr.mxu1 %v2007_v0  ;;  %1901 = vmatprep.mubr.msk.f32.mxu1 %vm2008_vm0, %v2007_v0  ;;  %s1944_s16 = smul.u32 12, %s2236_s12  ;;  %v1826_v13 = vld [vmem:[%s2228_s1 + $0x8] sm:$0xff]  ;;  %vm225_vm2 = vcmask 31744   ;;  %v210_v16 = vld [vmem:[%s2228_s1] sm:$0xff]  ;;  %vm222_vm3 = vcmask 1039360   ;;  %v1837_v19 = vld [vmem:[%s2228_s1 + $0x10] sm:$0xff] }
   0xe   : > { %300 = vmatprep.mubr.f32.mxu0 %v2007_v0  ;;  %1981 = vset.pattern.permute.xlu0 %v2015_v10  ;;  %vm540_vm4 = vcmask 1031168   ;;  %v1843_v26 = vld [vmem:[%s2228_s1 + $0x18] sm:$0xff]  ;;  %vm709_vm5 = vcmask 900096   ;;  %vm878_vm6 = vcmask 891904   ;;  %v1849_v35 = vld [vmem:[%s2228_s1 + $0x20] sm:$0xff]  ;;  %vm1047_vm7 = vcmask 883712  }
   0xf   : > { %s2066_s19 = scalar_lea.vmem %s2227_s0, %s1944_s16  ;;  %v1855_v40 = vld [vmem:[%s2228_s1 + $0x28] sm:$0xff]  ;;  %vm1216_vm8 = vcmask 752640   ;;  %v1861_v45 = vld [vmem:[%s2228_s1 + $0x30] sm:$0xff]  ;;  %vm1385_vm9 = vcmask 744448   ;;  %v1867_v50 = vld [vmem:[%s2228_s1 + $0x38] sm:$0xff]  ;;  %vm1554_vm10 = vcmask 736256  }
  0x10   : > { %v209_v1 = vld [vmem:[%s2066_s19 + $0x8] sm:$0xf]  ;;  %v2070_v2 = vld [vmem:[%s2066_s19] sm:$0xff]  ;;  %vm1727_vm11 = vcmask 261120  }
  0x11   : > { %220 = vrot.lane.b32.xlu0 %v209_v1, %s2009_s20  ;;  %216 = vrot.lane.b32.xlu1 %v2070_v2, %s2009_s20  ;;  %v528_v3 = vld [vmem:[%s2066_s19 + $0x8] sm:$0xf]  ;;  %v2076_v4 = vcombine.high %v2070_v2, %v2070_v2  ;;  %v1873_v57 = vld [vmem:[%s2228_s1 + $0x40] sm:$0xff] }
  0x12   : > { %v697_v5 = vld [vmem:[%s2066_s19 + $0x8] sm:$0xf] }
  0x13   : > { %v866_v6 = vld [vmem:[%s2066_s19 + $0x8] sm:$0xf] }
  0x14   : > { %v1035_v7 = vld [vmem:[%s2066_s19 + $0x8] sm:$0xf] }
  0x15   : > { %538 = vrot.lane.b32.xlu0 %v528_v3, %s2010_s21  ;;  %534 = vrot.lane.b32.xlu1 %v2070_v2, %s2010_s21  ;;  %v1204_v8 = vld [vmem:[%s2066_s19 + $0x8] sm:$0xf] }
  0x16   : > { %v1373_v9 = vld [vmem:[%s2066_s19 + $0x8] sm:$0xf] }
  0x17   : > { %v1542_v11 = vld [vmem:[%s2066_s19 + $0x8] sm:$0xf] }
  0x19   : > { %536 = vrot.lane.b32.xlu1 %v2076_v4, %s2010_s21  ;;  %218 = vrot.lane.b32.xlu0 %v2076_v4, %s2009_s20 }
  0x1d   : > { %707 = vrot.lane.b32.xlu1 %v697_v5, %s2011_s22  ;;  %705 = vrot.lane.b32.xlu0 %v2076_v4, %s2011_s22 }
  0x21   : > { %874 = vrot.lane.b32.xlu1 %v2076_v4, %s2012_s23  ;;  %703 = vrot.lane.b32.xlu0 %v2070_v2, %s2011_s22 }
  0x25   : > { %872 = vrot.lane.b32.xlu1 %v2070_v2, %s2012_s23  ;;  %876 = vrot.lane.b32.xlu0 %v866_v6, %s2012_s23 }
  0x29   : > { %1045 = vrot.lane.b32.xlu1 %v1035_v7, %s2013_s24  ;;  %1043 = vrot.lane.b32.xlu0 %v2076_v4, %s2013_s24 }
  0x2d   : > { %1212 = vrot.lane.b32.xlu1 %v2076_v4, %s2014_s25  ;;  %1041 = vrot.lane.b32.xlu0 %v2070_v2, %s2013_s24 }
  0x31   : > { %1210 = vrot.lane.b32.xlu1 %v2070_v2, %s2014_s25  ;;  %1214 = vrot.lane.b32.xlu0 %v1204_v8, %s2014_s25  ;;  %s1945_s25 = smul.u32 24, %s2236_s12 }
  0x33   : > { %s206_s28 = scalar_lea.vmem %s2230_s3, %s1945_s25 }
  0x35   : > { %1383 = vrot.lane.b32.xlu1 %v1373_v9, %s2016_s26  ;;  %1381 = vrot.lane.b32.xlu0 %v2076_v4, %s2016_s26 }
  0x39   : > { %1550 = vrot.lane.b32.xlu1 %v2076_v4, %s2017_s27  ;;  %1379 = vrot.lane.b32.xlu0 %v2070_v2, %s2016_s26 }
  0x3d   : > { %1548 = vrot.lane.b32.xlu1 %v2070_v2, %s2017_s27  ;;  %1552 = vrot.lane.b32.xlu0 %v1542_v11, %s2017_s27 }
  0x41   : > { %1713 = vperm.xlu0 %1981, %v1710_v12  }
  0x83   : > { %v221_v14 = vpop.permute.xlu0 %220  ;;  %v217_v15 = vpop.permute.xlu1 %216 }
  0x84   : > { %1900 = vmatpush3.msk.msra.mxu1 %vm229_vm1, %v221_v14 }
  0x85   : > { %1902 = vmatmul.mubr.msk.f32.vlgmr.msra.gmra.mxu1 %vm225_vm2, %v1826_v13  ;;  %1904 = vmatprep.subr.mxu1 %v2007_v0 }
  0x86   : > { %1905 = vmatpush3.msk.msra.mxu1 %vm229_vm1, %v209_v1  ;;  %1906 = vmatprep.mubr.msk.f32.mxu1 %vm2008_vm0, %v2007_v0 }
  0x87   : > { %v539_v17 = vpop.permute.xlu0 %538  ;;  %v535_v18 = vpop.permute.xlu1 %534  ;;  %1909 = vmatprep.subr.mxu1 %v2007_v0 }
  0x89   : > { %1907 = vmatmul.mubr.msk.f32.vlgmr.msra.gmra.mxu1 %vm225_vm2, %v210_v16 }
  0x8a   : > { %1910 = vmatpush3.msk.msra.mxu1 %vm229_vm1, %v539_v17  ;;  %1911 = vmatprep.mubr.msk.f32.mxu1 %vm2008_vm0, %v2007_v0 }
  0x8b   : > { %v537_v20 = vpop.permute.xlu1 %536  ;;  %v219_v21 = vpop.permute.xlu0 %218  ;;  %1914 = vmatprep.subr.mxu1 %v2007_v0 }
  0x8c   : > { %v224_v22 = vsel %vm222_vm3, %v219_v21, %v221_v14  ;;  %v223_v23 = vsel %vm222_vm3, %v217_v15, %v219_v21  ;;  %v542_v27 = vsel %vm540_vm4, %v537_v20, %v539_v17  ;;  %v541_v28 = vsel %vm540_vm4, %v535_v18, %v537_v20 }
  0x8d   : > { %1827 = vmatprep.subr.msk.mxu0 %vm229_vm1, %v224_v22  ;;  %1912 = vmatmul.mubr.msk.f32.vlgmr.msra.gmra.mxu1 %vm225_vm2, %v1837_v19 }
  0x8e   : > { %1828 = vmatpush1.msk.msra.mxu0 %vm229_vm1, %v223_v23  ;;  %1916 = vmatprep.mubr.msk.f32.mxu1 %vm2008_vm0, %v2007_v0 }
  0x8f   : > { %v708_v24 = vpop.permute.xlu1 %707  ;;  %1829 = vmatmul.mubr.msk.f32.vlgmr.msra.gmra.mxu0 %vm225_vm2, %v1826_v13  ;;  %1832 = vmatprep.subr.msk.mxu0 %vm229_vm1, %v2076_v4  ;;  %v706_v25 = vpop.permute.xlu0 %705 }
  0x90   : > { %1833 = vmatpush1.msk.msra.mxu0 %vm229_vm1, %v2070_v2  ;;  %1915 = vmatpush3.msk.msra.mxu1 %vm229_vm1, %v708_v24  ;;  %v711_v31 = vsel %vm709_vm5, %v706_v25, %v708_v24 }
  0x91   : > { %1838 = vmatprep.subr.msk.mxu0 %vm229_vm1, %v542_v27  ;;  %450 = vmatprep.mubr.f32.mxu0 %v2007_v0 }
  0x92   : > { %1919 = vmatprep.subr.mxu1 %v2007_v0  ;;  %1917 = vmatmul.mubr.msk.f32.vlgmr.msra.gmra.mxu1 %vm225_vm2, %v1843_v26 }
  0x93   : > { %v875_v29 = vpop.permute.xlu1 %874  ;;  %1834 = vmatmul.mubr.msk.f32.vlgmr.msra.gmra.mxu0 %vm225_vm2, %v210_v16  ;;  %v704_v30 = vpop.permute.xlu0 %703  ;;  %1921 = vmatprep.mubr.msk.f32.mxu1 %vm2008_vm0, %v2007_v0 }
  0x94   : > { %1839 = vmatpush1.msk.msra.mxu0 %vm229_vm1, %v541_v28  ;;  %616 = vmatprep.mubr.f32.mxu0 %v2007_v0  ;;  %v710_v32 = vsel %vm709_vm5, %v704_v30, %v706_v25 }
  0x95   : > { %1844 = vmatprep.subr.msk.mxu0 %vm229_vm1, %v711_v31 }
  0x97   : > { %v873_v33 = vpop.permute.xlu1 %872  ;;  %1840 = vmatmul.mubr.msk.f32.vlgmr.msra.gmra.mxu0 %vm225_vm2, %v1837_v19  ;;  %v877_v34 = vpop.permute.xlu0 %876 }
  0x98   : > { %1845 = vmatpush1.msk.msra.mxu0 %vm229_vm1, %v710_v32  ;;  %v880_v36 = vsel %vm878_vm6, %v875_v29, %v877_v34  ;;  %1920 = vmatpush3.msk.msra.mxu1 %vm229_vm1, %v877_v34  ;;  %v879_v37 = vsel %vm878_vm6, %v873_v33, %v875_v29 }
  0x99   : > { %1850 = vmatprep.subr.msk.mxu0 %vm229_vm1, %v880_v36  ;;  %785 = vmatprep.mubr.f32.mxu0 %v2007_v0 }
  0x9a   : > { %1922 = vmatmul.mubr.msk.f32.vlgmr.msra.gmra.mxu1 %vm225_vm2, %v1849_v35  ;;  %1924 = vmatprep.subr.mxu1 %v2007_v0 }
  0x9b   : > { %v1046_v38 = vpop.permute.xlu1 %1045  ;;  %1846 = vmatmul.mubr.msk.f32.vlgmr.msra.gmra.mxu0 %vm225_vm2, %v1843_v26  ;;  %v1044_v39 = vpop.permute.xlu0 %1043  ;;  %1926 = vmatprep.mubr.msk.f32.mxu1 %vm2008_vm0, %v2007_v0 }
  0x9c   : > { %1851 = vmatpush1.msk.msra.mxu0 %vm229_vm1, %v879_v37  ;;  %v1049_v41 = vsel %vm1047_vm7, %v1044_v39, %v1046_v38  ;;  %1925 = vmatpush3.msk.msra.mxu1 %vm229_vm1, %v1046_v38 }
  0x9d   : > { %1856 = vmatprep.subr.msk.mxu0 %vm229_vm1, %v1049_v41  ;;  %954 = vmatprep.mubr.f32.mxu0 %v2007_v0 }
  0x9e   : > { %1927 = vmatmul.mubr.msk.f32.vlgmr.msra.gmra.mxu1 %vm225_vm2, %v1855_v40  ;;  %1929 = vmatprep.subr.mxu1 %v2007_v0 }
  0x9f   : > { %v1213_v42 = vpop.permute.xlu1 %1212  ;;  %1852 = vmatmul.mubr.msk.f32.vlgmr.msra.gmra.mxu0 %vm225_vm2, %v1849_v35  ;;  %v1042_v43 = vpop.permute.xlu0 %1041  ;;  %1931 = vmatprep.mubr.msk.f32.mxu1 %vm2008_vm0, %v2007_v0 }
  0xa0   : > { %v1048_v44 = vsel %vm1047_vm7, %v1042_v43, %v1044_v39  ;;  %1123 = vmatprep.mubr.f32.mxu0 %v2007_v0 }
  0xa1   : > { %1857 = vmatpush1.msk.msra.mxu0 %vm229_vm1, %v1048_v44 }
  0xa3   : > { %v1211_v46 = vpop.permute.xlu1 %1210  ;;  %1858 = vmatmul.mubr.msk.f32.vlgmr.msra.gmra.mxu0 %vm225_vm2, %v1855_v40  ;;  %v1215_v47 = vpop.permute.xlu0 %1214 }
  0xa4   : > { %v1217_v48 = vsel %vm1216_vm8, %v1211_v46, %v1213_v42  ;;  %v1218_v49 = vsel %vm1216_vm8, %v1213_v42, %v1215_v47  ;;  %1930 = vmatpush3.msk.msra.mxu1 %vm229_vm1, %v1215_v47  ;;  %1292 = vmatprep.mubr.f32.mxu0 %v2007_v0 }
  0xa5   : > { %1862 = vmatprep.subr.msk.mxu0 %vm229_vm1, %v1218_v49  ;;  %1932 = vmatmul.mubr.msk.f32.vlgmr.msra.gmra.mxu1 %vm225_vm2, %v1861_v45 }
  0xa6   : > { %1863 = vmatpush1.msk.msra.mxu0 %vm229_vm1, %v1217_v48  ;;  %1934 = vmatprep.subr.mxu1 %v2007_v0 }
  0xa7   : > { %v1384_v51 = vpop.permute.xlu1 %1383  ;;  %1864 = vmatmul.mubr.msk.f32.vlgmr.msra.gmra.mxu0 %vm225_vm2, %v1861_v45  ;;  %v1382_v52 = vpop.permute.xlu0 %1381  ;;  %1936 = vmatprep.mubr.msk.f32.mxu1 %vm2008_vm0, %v2007_v0 }
  0xa8   : > { %v1387_v53 = vsel %vm1385_vm9, %v1382_v52, %v1384_v51  ;;  %1935 = vmatpush3.msk.msra.mxu1 %vm229_vm1, %v1384_v51  ;;  %1461 = vmatprep.mubr.f32.mxu0 %v2007_v0 }
  0xa9   : > { %1868 = vmatprep.subr.msk.mxu0 %vm229_vm1, %v1387_v53  ;;  %1937 = vmatmul.mubr.msk.f32.vlgmr.msra.gmra.mxu1 %vm225_vm2, %v1867_v50 }
  0xaa   : > { %1939 = vmatprep.subr.mxu1 %v2007_v0  ;;  %1941 = vmatprep.mubr.msk.f32.mxu1 %vm2008_vm0, %v2007_v0 }
  0xab   : > { %v1551_v54 = vpop.permute.xlu1 %1550  ;;  %v1380_v55 = vpop.permute.xlu0 %1379 }
  0xac   : > { %v1386_v56 = vsel %vm1385_vm9, %v1380_v55, %v1382_v52 }
  0xad   : > { %1869 = vmatpush1.msk.msra.mxu0 %vm229_vm1, %v1386_v56 }
  0xae   : > { %1870 = vmatmul.mubr.msk.f32.vlgmr.msra.gmra.mxu0 %vm225_vm2, %v1867_v50 }
  0xaf   : > { %v1549_v58 = vpop.permute.xlu1 %1548  ;;  %v1553_v59 = vpop.permute.xlu0 %1552  ;;  %1630 = vmatprep.mubr.f32.mxu0 %v2007_v0 }
  0xb0   : > { %v1555_v60 = vsel %vm1554_vm10, %v1549_v58, %v1551_v54  ;;  %v1556_v61 = vsel %vm1554_vm10, %v1551_v54, %v1553_v59  ;;  %1940 = vmatpush3.msk.msra.mxu1 %vm229_vm1, %v1553_v59 }
  0xb1   : > { %1874 = vmatprep.subr.msk.mxu0 %vm229_vm1, %v1556_v61  ;;  %1942 = vmatmul.mubr.msk.f32.vlgmr.msra.gmra.mxu1 %vm225_vm2, %v1873_v57 }
  0xb2   : > { %1875 = vmatpush1.msk.msra.mxu0 %vm229_vm1, %v1555_v60 }
  0xb3   : > { %1876 = vmatmul.mubr.msk.f32.vlgmr.msra.gmra.mxu0 %vm225_vm2, %v1873_v57 }
  0xbc   : > { %v1714_v49 = vpop.permute.xlu0 %1713 }
 0x145   : > { %v373_v62 = vpop.f32.mrf.mxu1 }
 0x147   : > { %v1903_v63 = vpop.f32.mrf.mxu1 }
 0x149   : > { %v523_v1 = vpop.f32.mrf.mxu1 }
 0x14a   : > { %v524_v14 = vadd.f32 %v523_v1, %v373_v62 }
 0x14b   : > { %v1908_v2 = vpop.f32.mrf.mxu1 }
 0x14d   : > { %v689_v3 = vpop.f32.mrf.mxu1 }
 0x14e   : > { %v695_v19 = vadd.f32 %v689_v3, %v524_v14 }
 0x14f   : > { %v302_v4 = vpop.f32.mrf.mxu0  ;;  %v1913_v5 = vpop.f32.mrf.mxu1 }
 0x151   : > { %v304_v0 = vpop.f32.mrf.mxu0 }
 0x152   : > { %v858_v6 = vpop.f32.mrf.mxu1 }
 0x153   : > { %v452_v7 = vpop.f32.mrf.mxu0  ;;  %v864_v23 = vadd.f32 %v858_v6, %v695_v19 }
 0x154   : > { %v1918_v8 = vpop.f32.mrf.mxu1  ;;  %v453_v26 = vadd.f32 %v452_v7, %v302_v4 }
 0x155   : > { %v454_v9 = vpop.f32.mrf.mxu0 }
 0x156   : > { %v455_v28 = vadd.f32 %v454_v9, %v304_v0 }
 0x157   : > { %v618_v10 = vpop.f32.mrf.mxu0 }
 0x158   : > { %v693_v29 = vadd.f32 %v618_v10, %v453_v26 }
 0x159   : > { %v620_v11 = vpop.f32.mrf.mxu0 }
 0x15a   : > { %v1027_v12 = vpop.f32.mrf.mxu1  ;;  %v694_v33 = vadd.f32 %v620_v11, %v455_v28 }
 0x15b   : > { %v787_v13 = vpop.f32.mrf.mxu0  ;;  %v1033_v30 = vadd.f32 %v1027_v12, %v864_v23 }
 0x15c   : > { %v1923_v15 = vpop.f32.mrf.mxu1  ;;  %v862_v34 = vadd.f32 %v787_v13, %v693_v29 }
 0x15d   : > { %v789_v16 = vpop.f32.mrf.mxu0 }
 0x15e   : > { %v1196_v17 = vpop.f32.mrf.mxu1  ;;  %v863_v36 = vadd.f32 %v789_v16, %v694_v33 }
 0x15f   : > { %v956_v18 = vpop.f32.mrf.mxu0  ;;  %v1202_v38 = vadd.f32 %v1196_v17, %v1033_v30 }
 0x160   : > { %v1928_v20 = vpop.f32.mrf.mxu1  ;;  %v1031_v37 = vadd.f32 %v956_v18, %v862_v34 }
 0x161   : > { %v958_v21 = vpop.f32.mrf.mxu0 }
 0x162   : > { %v1032_v40 = vadd.f32 %v958_v21, %v863_v36 }
 0x163   : > { %v1125_v22 = vpop.f32.mrf.mxu0 }
 0x164   : > { %v1200_v41 = vadd.f32 %v1125_v22, %v1031_v37 }
 0x165   : > { %v1127_v24 = vpop.f32.mrf.mxu0  ;;  %v1365_v25 = vpop.f32.mrf.mxu1 }
 0x166   : > { %v1371_v42 = vadd.f32 %v1365_v25, %v1202_v38  ;;  %v1201_v44 = vadd.f32 %v1127_v24, %v1032_v40 }
 0x167   : > { %v1933_v27 = vpop.f32.mrf.mxu1  ;;  %v1294_v31 = vpop.f32.mrf.mxu0 }
 0x168   : > { %v1369_v45 = vadd.f32 %v1294_v31, %v1200_v41 }
 0x169   : > { %v1534_v32 = vpop.f32.mrf.mxu1  ;;  %v1296_v39 = vpop.f32.mrf.mxu0 }
 0x16a   : > { %v1540_v46 = vadd.f32 %v1534_v32, %v1371_v42  ;;  %v1370_v50 = vadd.f32 %v1296_v39, %v1201_v44 }
 0x16b   : > { %v1938_v35 = vpop.f32.mrf.mxu1 }
 0x16e   : > { %v1463_v43 = vpop.f32.mrf.mxu0 }
 0x16f   : > { %v1538_v51 = vadd.f32 %v1463_v43, %v1369_v45 }
 0x170   : > { %v1465_v47 = vpop.f32.mrf.mxu0 }
 0x171   : > { %v1703_v48 = vpop.f32.mrf.mxu1  ;;  %v1539_v55 = vadd.f32 %v1465_v47, %v1370_v50 }
 0x172   : > { %v1709_v52 = vadd.f32 %v1703_v48, %v1540_v46 }
 0x173   : > { %v1632_v53 = vpop.f32.mrf.mxu0  ;;  %v1943_v54 = vpop.f32.mrf.mxu1 }
 0x174   : > { %v1707_v56 = vadd.f32 %v1632_v53, %v1538_v51  ;;  %v1718_v57 = vadd.f32 %v1714_v49, %v1709_v52 }
 0x175   : > { %v1634_v58 = vpop.f32.mrf.mxu0 }
 0x176   : > { %v1716_v59 = vadd.f32 %v1714_v49, %v1707_v56  ;;  %v1721_v60 = vmul.f32 0.2, %v1718_v57  ;;  %v1708_v61 = vadd.f32 %v1634_v58, %v1539_v55 }
 0x178   : > { %v1719_v62 = vmul.f32 0.2, %v1716_v59  ;;  %v1724_v63 = vmax.f32 %v1718_v57, %v1721_v60  ;;  %v1717_v1 = vadd.f32 %v1714_v49, %v1708_v61 }
 0x17a   : > { %v1722_v2 = vmax.f32 %v1716_v59, %v1719_v62  ;;  %1728 = vst.msk [vmem:[%s206_s28 + $0x10] sm:$0xff] %vm1727_vm11, %v1724_v63  ;;  %v1720_v3 = vmul.f32 0.2, %v1717_v1 }
 0x17c   : > { %1725 = vst [vmem:[%s206_s28] sm:$0xff] %v1722_v2  ;;  %v1723_v4 = vmax.f32 %v1717_v1, %v1720_v3 }
 0x17e   : > { %1726 = vst [vmem:[%s206_s28 + $0x8] sm:$0xff] %v1723_v4 }
 0x17f PF: > { %s13_s14 = sadd.s32 1, %s2005_s14   ;;  %s2231_s12 = smov %s2001_s13 }
 0x180   : > { %p10_p5 = scmp.ge.s32.totalorder %s13_s14, 4   ;;  %s2232_s13 = smov %s2234_s15 }
 0x182   :  { %12 = sbr.rel (!%p10_p5) target bundleno = 2 (0x2), region = 70 }

</bundles_post_ra>
